<compile_context>
chip_gen: v7x
topology: tpu7x:2x2x1
jax: 0.10.0
libtpu: 0.0.40
codegen_flags: <defaults>
</compile_context>

<pallas_src>
from functools import partial

import jax
import jax.numpy as jnp
from jax.experimental import pallas as pl
from jax.experimental.pallas import tpu as pltpu

EPS = 1e-5


def _transition_up_kernel(scale_ref, bias_ref, w_ref, x_ref, o_ref, *, img_w):
    """Fused BN(scale/bias) + ReLU + ConvTranspose2d(k=3, s=2, p=1, op=1).

    scale/bias: (Cin, 1)  f32        folded BatchNorm scale / bias
    w_ref:      (16*Cout, Cin) bf16  rows = group(4) x parity(4) x cout, group order
                [from x(i,j), x(i,j+1), x(i+1,j), x(i+1,j+1)], parity [ee,eo,oe,oo]
    x_ref:      (B, Cin, H*W) bf16   B whole images, NCHW flattened (spatial on lanes)
    o_ref:      (B, 4*Cout, H*W) f32 per-channel parity planes [ee|eo|oe|oo]
    """
    bb, _, hw = x_ref.shape
    co4 = o_ref.shape[1]                                 # 4 * Cout

    scale = scale_ref[...]                               # (Cin, 1): lane broadcast
    bias = bias_ref[...]
    w_all = w_ref[...]                                   # (16*Cout, Cin) bf16

    # Border masks on the lane (flattened H*W) axis, hoisted out of the image loop.
    lane = jax.lax.broadcasted_iota(jnp.int32, (1, hw), 1)
    mask_c = (lane % img_w) != (img_w - 1)               # source col j+1 exists
    mask_r = lane < (hw - img_w)                         # source row i+1 exists
    mask_cr = jnp.logical_and(mask_c, mask_r)

    for b in range(bb):                                  # static unroll (bb is small)
        # BN + ReLU (fp32 FMA), bf16 operands for the MXU.
        xb = x_ref[b].astype(jnp.float32)                                # (Cin, HW)
        xn = jnp.maximum(xb * scale + bias, 0.0).astype(jnp.bfloat16)

        # One MXU matmul for all four shift-class groups, fp32 accumulation.
        y = jnp.dot(w_all, xn, preferred_element_type=jnp.float32)       # (4*co4, HW)

        # 8-aligned sublane slices per shift-class group (no sub-lane tap slicing).
        y0 = y[0 * co4:1 * co4]                          # from x[i, j]
        y1 = y[1 * co4:2 * co4]                          # from x[i, j+1]
        y2 = y[2 * co4:3 * co4]                          # from x[i+1, j]
        y3 = y[3 * co4:4 * co4]                          # from x[i+1, j+1]

        # Lane rolls (XLU slot) bring the +1-shifted contributions to their output
        # position (roll by hw-k == roll by -k); masks zero the right/bottom borders.
        out = (y0
               + jnp.where(mask_c, pltpu.roll(y1, hw - 1, axis=1), 0.0)
               + jnp.where(mask_r, pltpu.roll(y2, hw - img_w, axis=1), 0.0)
               + jnp.where(mask_cr, pltpu.roll(y3, hw - img_w - 1, axis=1), 0.0))
        o_ref[b] = out                                   # lane-dense (HW-wide) store


def _build_weight_groups(weight):
    """ConvTranspose2d weight (Cin, Cout, 3, 3) -> (16*Cout, Cin) bf16.

    Row order: group-major, then parity [ee|eo|oe|oo], then cout.  Output parity:
      ee(2i,2j)     <- x[i,j]*w[1,1]
      eo(2i,2j+1)   <- x[i,j]*w[1,2] + x[i,j+1]*w[1,0]
      oe(2i+1,2j)   <- x[i,j]*w[2,1] + x[i+1,j]*w[0,1]
      oo(2i+1,2j+1) <- x[i,j]*w[2,2] + x[i,j+1]*w[2,0] + x[i+1,j]*w[0,2] + x[i+1,j+1]*w[0,0]
    """
    def tap(kh, kw):
        return jnp.transpose(weight[:, :, kh, kw], (1, 0))        # (Cout, Cin)

    zero = jnp.zeros_like(tap(0, 0))
    blocks = [
        tap(1, 1), tap(1, 2), tap(2, 1), tap(2, 2),   # group 0: from x[i, j]
        zero,      tap(1, 0), zero,      tap(2, 0),   # group 1: from x[i, j+1]
        zero,      zero,      tap(0, 1), tap(0, 2),   # group 2: from x[i+1, j]
        zero,      zero,      zero,      tap(0, 0),   # group 3: from x[i+1, j+1]
    ]
    return jnp.concatenate(blocks, axis=0).astype(jnp.bfloat16)    # (16*Cout, Cin)


def _vmem_capacity_bytes():
    """Per-generation VMEM capacity (v7x: 64 MiB/TC, v5e/v6e: 128 MiB); safe fallback."""
    try:
        info = pltpu.get_tpu_info()
        cap = int(getattr(info, "vmem_capacity_bytes", 0))
        if cap > 0:
            return cap
    except Exception:
        pass
    return 64 * 1024 * 1024


def _pick_batch_block(n, per_image_bytes, budget_bytes):
    """Largest divisor of n fitting the VMEM budget; keep >=2 grid steps (v7x 2 TCs)."""
    divisors = [d for d in range(1, n + 1) if n % d == 0]
    fits = [d for d in divisors if 4 * d * per_image_bytes <= budget_bytes] or [1]
    two_step = [d for d in fits if n // d >= 2]
    return max(two_step) if two_step else max(fits)


@partial(jax.jit, static_argnames=("batch_block",))
def densenet_transition_up(x_nchw, gamma, beta, weight, *, batch_block=None):
    """x_nchw: (N, Cin, H, W); weight: (Cin, Cout, 3, 3) as in nn.ConvTranspose2d."""
    N, Cin, H, W = x_nchw.shape
    Cout = weight.shape[1]
    HW = H * W
    Co4 = 4 * Cout

    x32 = x_nchw.astype(jnp.float32)

    # BatchNorm2d(track_running_stats=False): batch statistics on the original NCHW
    # tensor (no transposed copy), two-pass variance, folded into one per-channel FMA.
    mean = jnp.mean(x32, axis=(0, 2, 3))
    var = jnp.var(x32, axis=(0, 2, 3))
    scale = gamma.astype(jnp.float32) * jax.lax.rsqrt(var + EPS)
    bias = beta.astype(jnp.float32) - mean * scale
    scale = scale.reshape(Cin, 1)
    bias = bias.reshape(Cin, 1)

    # bf16 input stream; NCHW kept as-is (free reshape only, no wrapper transpose).
    x_in = x_nchw.astype(jnp.bfloat16).reshape(N, Cin, HW)

    # Shift-class / parity-major weight layout for a single wide MXU matmul.
    w_all = _build_weight_groups(weight.astype(jnp.float32))      # (16*Cout, Cin)

    # Size-driven batch blocking with a per-generation VMEM budget.
    per_image = Cin * HW * 2 + Co4 * HW * 4 + 4 * Co4 * HW * 4    # x + out + matmul result
    vmem_cap = _vmem_capacity_bytes()
    if batch_block is None:
        batch_block = _pick_batch_block(N, per_image, vmem_cap // 3)
    assert N % batch_block == 0, (N, batch_block)
    grid = (N // batch_block,)
    vmem_limit = int(min(0.75 * vmem_cap,
                         max(32 * 1024 * 1024, 8 * batch_block * per_image)))

    out = pl.pallas_call(
        partial(_transition_up_kernel, img_w=W),
        grid=grid,
        in_specs=[
            pl.BlockSpec((Cin, 1), lambda g: (0, 0)),
            pl.BlockSpec((Cin, 1), lambda g: (0, 0)),
            pl.BlockSpec((16 * Cout, Cin), lambda g: (0, 0)),
            pl.BlockSpec((batch_block, Cin, HW), lambda g: (g, 0, 0)),
        ],
        out_specs=pl.BlockSpec((batch_block, Co4, HW), lambda g: (g, 0, 0)),
        out_shape=jax.ShapeDtypeStruct((N, Co4, HW), jnp.float32),
        compiler_params=pltpu.CompilerParams(
            dimension_semantics=("parallel",),
            vmem_limit_bytes=vmem_limit,
        ),
    )(scale, bias, w_all, x_in)

    # Parity interleave + NCHW: (N, [di,dj,c], i*W+j) -> (N, Cout, 2H, 2W).
    o = out.reshape(N, 2, 2, Cout, H, W)
    o = jnp.transpose(o, (0, 3, 4, 1, 5, 2))
    return o.reshape(N, Cout, 2 * H, 2 * W)


# ----------------------------- references for testing -----------------------------
def _conv_transpose_ref(xn, weight, precision=None):
    # ConvTranspose2d(k=3, s=2, p=1, op=1, bias=False) as an lhs-dilated convolution.
    wf = jnp.flip(weight, axis=(2, 3))               # flip spatial taps
    wf = jnp.transpose(wf, (1, 0, 2, 3))             # (Cin, Cout, kh, kw) -> OIHW
    return jax.lax.conv_general_dilated(
        xn, wf, window_strides=(1, 1), padding=[(1, 2), (1, 2)],
        lhs_dilation=(2, 2), rhs_dilation=(1, 1),
        dimension_numbers=("NCHW", "OIHW", "NCHW"),
        preferred_element_type=jnp.float32, precision=precision)


def _reference_fp32(x_nchw, gamma, beta, weight):
    """Pure-fp32 reference of the PyTorch forward (BN batch stats + ReLU + ConvT)."""
    x = x_nchw.astype(jnp.float32)
    mean = x.mean(axis=(0, 2, 3), keepdims=True)
    var = ((x - mean) ** 2).mean(axis=(0, 2, 3), keepdims=True)
    xn = (x - mean) * jax.lax.rsqrt(var + EPS)
    xn = xn * gamma.reshape(1, -1, 1, 1) + beta.reshape(1, -1, 1, 1)
    xn = jnp.maximum(xn, 0.0)
    return _conv_transpose_ref(xn, weight, precision=jax.lax.Precision.HIGHEST)


def _reference_matched(x_nchw, gamma, beta, weight):
    """Reference with the kernel's precision: bf16 input / bf16 MXU operands / fp32 acc."""
    x = x_nchw.astype(jnp.float32)
    mean = jnp.mean(x, axis=(0, 2, 3))
    var = jnp.var(x, axis=(0, 2, 3))
    scale = gamma * jax.lax.rsqrt(var + EPS)
    bias = beta - mean * scale
    xb = x_nchw.astype(jnp.bfloat16).astype(jnp.float32)          # kernel's bf16 input
    xn = jnp.maximum(xb * scale.reshape(1, -1, 1, 1) + bias.reshape(1, -1, 1, 1), 0.0)
    return _conv_transpose_ref(xn.astype(jnp.bfloat16), weight.astype(jnp.bfloat16))


if __name__ == "__main__":
    key = jax.random.PRNGKey(0)
    kx, kw = jax.random.split(key)

    # Small shapes consistent with the module: c_in=40 -> c_out=int(0.1*40)=4.
    N, Cin, H, W = 2, 40, 16, 16
    Cout = int(0.1 * Cin)

    x = jax.random.normal(kx, (N, Cin, H, W), dtype=jnp.float32)
    # kaiming_normal_ on the ConvTranspose2d weight (Cin, Cout, 3, 3): fan_in = Cout*9.
    std = (2.0 / (Cout * 9)) ** 0.5
    weight = std * jax.random.normal(kw, (Cin, Cout, 3, 3), dtype=jnp.float32)
    gamma = jnp.ones((Cin,), jnp.float32)             # BatchNorm2d affine defaults
    beta = jnp.zeros((Cin,), jnp.float32)
    # Dropout2d(p=0.1) is constructed by the module but never used in forward().

    y = densenet_transition_up(x, gamma, beta, weight)
    y = jax.block_until_ready(y)
    assert y.shape == (N, Cout, 2 * H, 2 * W), y.shape

    # Tight check vs a reference with the kernel's precision (bf16 in / fp32 acc).
    y_matched = _reference_matched(x, gamma, beta, weight)
    err_matched = float(jnp.max(jnp.abs(y - y_matched)))
    assert jnp.allclose(y, y_matched, rtol=2e-2, atol=2e-2), err_matched

    # Sanity check vs the full-fp32 module reference (bf16 MXU operands loosen max error).
    y_fp32 = _reference_fp32(x, gamma, beta, weight)
    err_fp32 = float(jnp.max(jnp.abs(y - y_fp32)))
    assert jnp.allclose(y, y_fp32, rtol=5e-2, atol=5e-2), err_fp32

    print("KERNEL_OK")
</pallas_src>

<mosaic_0001>
module attributes {stable_mosaic.version = 11 : i64} {
  func.func @_transition_up_kernel(%arg0: i32, %arg1: memref<40x1xf32, #tpu.memory_space<vmem>>, %arg2: memref<40x1xf32, #tpu.memory_space<vmem>>, %arg3: memref<64x40xbf16, #tpu.memory_space<vmem>>, %arg4: memref<1x40x256xbf16, #tpu.memory_space<vmem>>, %arg5: memref<1x16x256xf32, #tpu.memory_space<vmem>>) attributes {dimension_semantics = [#tpu.dimension_semantics<parallel>], iteration_bounds = array<i64: 2>, scalar_prefetch = 0 : i64, scratch_operands = 0 : i64, tpu.core_type = #tpu.core_type<tc>, window_params = [{pipeline_mode = #tpu.pipeline_mode<synchronous>, transform_indices = @transform_0, window_bounds = array<i64: 40, 1>}, {pipeline_mode = #tpu.pipeline_mode<synchronous>, transform_indices = @transform_1, window_bounds = array<i64: 40, 1>}, {pipeline_mode = #tpu.pipeline_mode<synchronous>, transform_indices = @transform_2, window_bounds = array<i64: 64, 40>}, {transform_indices = @transform_3, window_bounds = array<i64: 1, 40, 256>}, {transform_indices = @transform_4, window_bounds = array<i64: 1, 16, 256>}]} {
    %c0 = arith.constant 0 : index
    %c0_0 = arith.constant 0 : index
    %0 = vector.load %arg1[%c0, %c0_0] : memref<40x1xf32, #tpu.memory_space<vmem>>, vector<40x1xf32>
    %c0_1 = arith.constant 0 : index
    %c0_2 = arith.constant 0 : index
    %1 = vector.load %arg2[%c0_1, %c0_2] : memref<40x1xf32, #tpu.memory_space<vmem>>, vector<40x1xf32>
    %c0_3 = arith.constant 0 : index
    %c0_4 = arith.constant 0 : index
    %2 = vector.load %arg3[%c0_3, %c0_4] : memref<64x40xbf16, #tpu.memory_space<vmem>>, vector<64x40xbf16>
    %3 = tpu.iota {dimensions = array<i32: 1>} : vector<1x256xi32>
    %c16_i32 = arith.constant 16 : i32
    %c0_i32 = arith.constant 0 : i32
    %4 = arith.cmpi eq, %c16_i32, %c0_i32 : i32
    %c1_i32 = arith.constant 1 : i32
    %5 = arith.select %4, %c1_i32, %c16_i32 : i32
    %6 = vector.broadcast %5 : i32 to vector<1x256xi32>
    %7 = arith.remsi %3, %6 : vector<1x256xi32>
    %c0_i32_5 = arith.constant 0 : i32
    %8 = vector.broadcast %c0_i32_5 : i32 to vector<1x256xi32>
    %9 = arith.cmpi ne, %7, %8 : vector<1x256xi32>
    %c0_i32_6 = arith.constant 0 : i32
    %10 = vector.broadcast %c0_i32_6 : i32 to vector<1x256xi32>
    %11 = arith.cmpi slt, %7, %10 : vector<1x256xi32>
    %c0_i32_7 = arith.constant 0 : i32
    %12 = arith.cmpi slt, %5, %c0_i32_7 : i32
    %13 = vector.broadcast %12 : i1 to vector<1x256xi1>
    %14 = vector.broadcast %13 : vector<1x256xi1> to vector<1x256xi1>
    %15 = arith.xori %11, %14 : vector<1x256xi1>
    %16 = arith.andi %15, %9 : vector<1x256xi1>
    %17 = vector.broadcast %5 : i32 to vector<1x256xi32>
    %18 = arith.addi %7, %17 : vector<1x256xi32>
    %19 = arith.select %16, %18, %7 : vector<1x256xi1>, vector<1x256xi32>
    %c15_i32 = arith.constant 15 : i32
    %20 = vector.broadcast %c15_i32 : i32 to vector<1x256xi32>
    %21 = arith.cmpi ne, %19, %20 : vector<1x256xi32>
    %c240_i32 = arith.constant 240 : i32
    %22 = vector.broadcast %c240_i32 : i32 to vector<1x256xi32>
    %23 = arith.cmpi slt, %3, %22 : vector<1x256xi32>
    %24 = arith.andi %21, %23 : vector<1x256xi1>
    %c0_8 = arith.constant 0 : index
    %c0_9 = arith.constant 0 : index
    %c0_10 = arith.constant 0 : index
    %25 = vector.load %arg4[%c0_8, %c0_9, %c0_10] : memref<1x40x256xbf16, #tpu.memory_space<vmem>>, vector<1x40x256xbf16>
    %26 = vector.shape_cast %25 : vector<1x40x256xbf16> to vector<40x256xbf16>
    %27 = arith.extf %26 : vector<40x256xbf16> to vector<40x256xf32>
    %28 = vector.broadcast %0 : vector<40x1xf32> to vector<40x256xf32>
    %29 = arith.mulf %27, %28 : vector<40x256xf32>
    %30 = vector.broadcast %1 : vector<40x1xf32> to vector<40x256xf32>
    %31 = arith.addf %29, %30 : vector<40x256xf32>
    %cst = arith.constant 0.000000e+00 : f32
    %32 = vector.broadcast %cst : f32 to vector<40x256xf32>
    %33 = arith.maximumf %31, %32 : vector<40x256xf32>
    %34 = arith.truncf %33 : vector<40x256xf32> to vector<40x256xbf16>
    %cst_11 = arith.constant dense<0.000000e+00> : vector<64x256xf32>
    %35 = tpu.matmul %2, %34, %cst_11 {dimension_numbers = #tpu.dot_dimension_numbers<[1], [0], [0], [1], [0, 0, 1, 1], [], []>} : vector<64x40xbf16>, vector<40x256xbf16>, vector<64x256xf32> -> vector<64x256xf32>
    %36 = vector.extract_strided_slice %35 {offsets = [0, 0], sizes = [16, 256], strides = [1, 1]} : vector<64x256xf32> to vector<16x256xf32>
    %37 = vector.extract_strided_slice %35 {offsets = [16, 0], sizes = [16, 256], strides = [1, 1]} : vector<64x256xf32> to vector<16x256xf32>
    %38 = vector.extract_strided_slice %35 {offsets = [32, 0], sizes = [16, 256], strides = [1, 1]} : vector<64x256xf32> to vector<16x256xf32>
    %39 = vector.extract_strided_slice %35 {offsets = [48, 0], sizes = [16, 256], strides = [1, 1]} : vector<64x256xf32> to vector<16x256xf32>
    %c255_i32 = arith.constant 255 : i32
    %40 = tpu.dynamic_rotate %37 by %c255_i32 dim 1 : vector<16x256xf32>, i32 -> vector<16x256xf32>
    %cst_12 = arith.constant 0.000000e+00 : f32
    %41 = vector.shape_cast %21 : vector<1x256xi1> to vector<1x256xi1>
    %42 = vector.broadcast %41 : vector<1x256xi1> to vector<16x256xi1>
    %43 = vector.broadcast %cst_12 : f32 to vector<16x256xf32>
    %44 = arith.select %42, %40, %43 : vector<16x256xi1>, vector<16x256xf32>
    %45 = arith.addf %36, %44 : vector<16x256xf32>
    %c240_i32_13 = arith.constant 240 : i32
    %46 = tpu.dynamic_rotate %38 by %c240_i32_13 dim 1 : vector<16x256xf32>, i32 -> vector<16x256xf32>
    %cst_14 = arith.constant 0.000000e+00 : f32
    %47 = vector.shape_cast %23 : vector<1x256xi1> to vector<1x256xi1>
    %48 = vector.broadcast %47 : vector<1x256xi1> to vector<16x256xi1>
    %49 = vector.broadcast %cst_14 : f32 to vector<16x256xf32>
    %50 = arith.select %48, %46, %49 : vector<16x256xi1>, vector<16x256xf32>
    %51 = arith.addf %45, %50 : vector<16x256xf32>
    %c239_i32 = arith.constant 239 : i32
    %52 = tpu.dynamic_rotate %39 by %c239_i32 dim 1 : vector<16x256xf32>, i32 -> vector<16x256xf32>
    %cst_15 = arith.constant 0.000000e+00 : f32
    %53 = vector.shape_cast %24 : vector<1x256xi1> to vector<1x256xi1>
    %54 = vector.broadcast %53 : vector<1x256xi1> to vector<16x256xi1>
    %55 = vector.broadcast %cst_15 : f32 to vector<16x256xf32>
    %56 = arith.select %54, %52, %55 : vector<16x256xi1>, vector<16x256xf32>
    %57 = arith.addf %51, %56 : vector<16x256xf32>
    %c0_16 = arith.constant 0 : index
    %c0_17 = arith.constant 0 : index
    %c0_18 = arith.constant 0 : index
    %58 = vector.load %arg5[%c0_16, %c0_17, %c0_18] : memref<1x16x256xf32, #tpu.memory_space<vmem>>, vector<1x16x256xf32>
    %59 = vector.shape_cast %58 : vector<1x16x256xf32> to vector<16x256xf32>
    %60 = vector.shape_cast %57 : vector<16x256xf32> to vector<1x16x256xf32>
    tpu.vector_store %arg5[%c0_16, %c0_17, %c0_18], %60 {strides = array<i32>} : memref<1x16x256xf32, #tpu.memory_space<vmem>>, vector<1x16x256xf32>,
    return
  }
  func.func @transform_0(%arg0: i32) -> (i32, i32) {
    %c0_i32 = arith.constant 0 : i32
    %c0_i32_0 = arith.constant 0 : i32
    %c0_i32_1 = arith.constant 0 : i32
    return %c0_i32, %c0_i32_0 : i32, i32
  }
  func.func @transform_1(%arg0: i32) -> (i32, i32) {
    %c0_i32 = arith.constant 0 : i32
    %c0_i32_0 = arith.constant 0 : i32
    %c0_i32_1 = arith.constant 0 : i32
    return %c0_i32, %c0_i32_0 : i32, i32
  }
  func.func @transform_2(%arg0: i32) -> (i32, i32) {
    %c0_i32 = arith.constant 0 : i32
    %c0_i32_0 = arith.constant 0 : i32
    %c0_i32_1 = arith.constant 0 : i32
    return %c0_i32, %c0_i32_0 : i32, i32
  }
  func.func @transform_3(%arg0: i32) -> (i32, i32, i32) {
    %c0_i32 = arith.constant 0 : i32
    %c0_i32_0 = arith.constant 0 : i32
    %c0_i32_1 = arith.constant 0 : i32
    return %arg0, %c0_i32, %c0_i32_0 : i32, i32, i32
  }
  func.func @transform_4(%arg0: i32) -> (i32, i32, i32) {
    %c0_i32 = arith.constant 0 : i32
    %c0_i32_0 = arith.constant 0 : i32
    %c0_i32_1 = arith.constant 0 : i32
    return %arg0, %c0_i32, %c0_i32_0 : i32, i32, i32
  }
}

</mosaic_0001>

<bundles_post_ra>
// kernel: densenet_transition_up.1
= control target key start
LH: loop header
LB: loop body
LE: loop exit
PB: predicated region body
PF: predicated region fallthrough
CT: control target
= control target key end

     0   :  { %s680_s15 = smov 0   ;;  %s801_s0 = inlined_call_operand.vmem [shape: f32[40,1], index: 0, kind: input, shape index: {}]   ;;  %s802_s1 = inlined_call_operand.vmem [shape: f32[40,1], index: 1, kind: input, shape index: {}]   ;;  %s803_s2 = inlined_call_operand.vmem [shape: bf16[64,40], index: 2, kind: input, shape index: {}]   ;;  %s804_s3 = inlined_call_operand.vmem [shape: bf16[2,40,256], index: 3, kind: input, shape index: {}]   ;;  %s805_s4 = inlined_call_operand.vmem [shape: f32[2,16,256], index: 4, kind: output, shape index: {}]  }
   0x1 LB: > { %s598_s16 = sadd.s32 4294967295, %s649_s15   ;;  %p602_p0 = scmp.ge.s32.totalorder %s649_s15, 1  ;;  %s649_s15 = sphi %s680_s15, %s14_s15  }
   0x2   : > { %p162_p1 = scmp.lt.s32.totalorder %s649_s15, 3 }
   0x4   : > { %p163_p2 = pnand %p602_p0, %p162_p1 }
   0x5   : > { %v204_v0 = vld [vmem:[%s802_s1] sm:$0xff] (!%p163_p2)  ;;  %v651_v2 = vmov (!%p163_p2), 0   ;;  %v205_v3 = vld [vmem:[%s802_s1 + $0x8] sm:$0xff] (!%p163_p2)  ;;  %v202_v5 = vld [vmem:[%s801_s0 + $0x18] sm:$0xff] (!%p163_p2)  ;;  %p188_p3 = scmp.lt.s32.totalorder (!%p163_p2), %s598_s16, 1  ;;  %vm384_vm0 = vcmask (!%p163_p2), 1043456  }
   0x6   : > { %166 = sbr.rel (%p163_p2) target bundleno = 518 (0x206), region = 36  ;;  %v199_v1 = vld [vmem:[%s801_s0] sm:$0xff] (!%p163_p2)  ;;  %638 = vset.pattern.permute.xlu1 (!%p163_p2), %v651_v2  ;;  %637 = vset.pattern.permute.xlu0 (!%p163_p2), %v651_v2  ;;  %v200_v4 = vld [vmem:[%s801_s0 + $0x8] sm:$0xff] (!%p163_p2)  ;;  %v201_v6 = vld [vmem:[%s801_s0 + $0x10] sm:$0xff] (!%p163_p2)  ;;  %vm371_vm1 = vcmask (!%p163_p2), 326656   ;;  %s652_s25 = smov (!%p163_p2), 112  }
   0x7   : > { %302 = vperm.xlu1 (!%p163_p2), %638, %v204_v0   ;;  %267 = vperm.xlu0 (!%p163_p2), %637, %v199_v1   ;;  %v207_v7 = vld [vmem:[%s802_s1 + $0x18] sm:$0xff] (!%p163_p2)  ;;  %v206_v8 = vld [vmem:[%s802_s1 + $0x10] sm:$0xff] (!%p163_p2)  ;;  %v208_v9 = vld [vmem:[%s802_s1 + $0x20] sm:$0xff] (!%p163_p2)  ;;  %s653_s26 = smov (!%p163_p2), 127   ;;  %s654_s27 = smov (!%p163_p2), 111  }
   0x8   : > { %423 = vmatprep.mubr.bf16.mxu0 (!%p163_p2), %v651_v2  ;;  %443 = vmatprep.mubr.bf16.mxu1 (!%p163_p2), %v651_v2  ;;  %v203_v10 = vld [vmem:[%s801_s0 + $0x20] sm:$0xff] (!%p163_p2) }
   0xb   : > { %307 = vperm.xlu1 (!%p163_p2), %638, %v205_v3   ;;  %272 = vperm.xlu0 (!%p163_p2), %637, %v200_v4  }
   0xd   : > { %s813_s16 = smov (!%p188_p3, %s598_s16), 1 }
   0xe   : > { %s624_s11 = smul.u32 40, %s813_s16  ;;  %s617_s28 = sshll.u32 %s813_s16, 5 }
   0xf   : > { %282 = vperm.xlu1 %638, %v202_v5   ;;  %277 = vperm.xlu0 %637, %v201_v6   ;;  %s197_s30 = scalar_lea.vmem %s805_s4, %s617_s28 }
  0x10   : > { %s192_s14 = scalar_lea.vmem %s804_s3, %s624_s11 }
  0x11   : > { %v250_v11 = vld [vmem:[%s192_s14] sm:$0xff]  ;;  %v251_v14 = vld [vmem:[%s192_s14 + $0x8] sm:$0xff]  ;;  %v253_v21 = vld [vmem:[%s192_s14 + $0x18] sm:$0xff] }
  0x12   : > { %v255_v12 = vunpack.c.l.bf16 %v250_v11  ;;  %v256_v13 = vunpack.c.h.bf16 %v250_v11  ;;  %v257_v17 = vunpack.c.l.bf16 %v251_v14  ;;  %v258_v18 = vunpack.c.h.bf16 %v251_v14  ;;  %v252_v24 = vld [vmem:[%s192_s14 + $0x10] sm:$0xff]  ;;  %v254_v37 = vld [vmem:[%s192_s14 + $0x20] sm:$0xff] }
  0x13   : > { %317 = vperm.xlu1 %638, %v207_v7   ;;  %312 = vperm.xlu0 %637, %v206_v8   ;;  %v261_v29 = vunpack.c.l.bf16 %v253_v21  ;;  %v262_v30 = vunpack.c.h.bf16 %v253_v21  ;;  %v259_v33 = vunpack.c.l.bf16 %v252_v24  ;;  %v260_v34 = vunpack.c.h.bf16 %v252_v24  ;;  %v640_v11 = vld [vmem:[%s803_s2 + $0x10] sm:$0xff]  }
  0x14   : > { %v263_v50 = vunpack.c.l.bf16 %v254_v37  ;;  %v264_v51 = vunpack.c.h.bf16 %v254_v37 }
  0x17   : > { %322 = vperm.xlu1 %638, %v208_v9   ;;  %287 = vperm.xlu0 %637, %v203_v10   ;;  %v639_v10 = vld [vmem:[%s803_s2] sm:$0xff]  }
  0x86   : > { %v303_v15 = vpop.permute.xlu1 %302  ;;  %v268_v16 = vpop.permute.xlu0 %267 }
  0x87   : > { %v290_v19 = vmul.f32 %v268_v16, %v255_v12  ;;  %v291_v20 = vmul.f32 %v268_v16, %v256_v13  ;;  %v641_v12 = vld [vmem:[%s803_s2 + $0x8] sm:$0xff]   ;;  %v642_v13 = vld [vmem:[%s803_s2 + $0x18] sm:$0xff]  }
  0x89   : > { %v325_v27 = vadd.f32 %v303_v15, %v290_v19  ;;  %v326_v28 = vadd.f32 %v303_v15, %v291_v20 }
  0x8a   : > { %v308_v22 = vpop.permute.xlu1 %307  ;;  %v273_v23 = vpop.permute.xlu0 %272 }
  0x8b   : > { %v292_v25 = vmul.f32 %v273_v23, %v257_v17  ;;  %v293_v26 = vmul.f32 %v273_v23, %v258_v18  ;;  %v336_v38 = vmax.f32 %v326_v28, 0.0  ;;  %v335_v40 = vmax.f32 %v325_v27, 0.0 }
  0x8d   : > { %v327_v31 = vadd.f32 %v308_v22, %v292_v25  ;;  %v328_v32 = vadd.f32 %v308_v22, %v293_v26 }
  0x8e   : > { %v283_v35 = vpop.permute.xlu1 %282  ;;  %v278_v36 = vpop.permute.xlu0 %277 }
  0x8f   : > { %v338_v39 = vmax.f32 %v328_v32, 0.0  ;;  %v337_v41 = vmax.f32 %v327_v31, 0.0  ;;  %v296_v42 = vmul.f32 %v283_v35, %v261_v29  ;;  %v297_v43 = vmul.f32 %v283_v35, %v262_v30 }
  0x90   : > { %v294_v44 = vmul.f32 %v278_v36, %v259_v33  ;;  %v295_v45 = vmul.f32 %v278_v36, %v260_v34  ;;  %v217_v30 = vlaneseq }
  0x91   : > { %v346_v48 = vpack.c.bf16 %v338_v39, %v336_v38  ;;  %v345_v49 = vpack.c.bf16 %v337_v41, %v335_v40 }
  0x92   : > { %v318_v46 = vpop.permute.xlu1 %317  ;;  %v313_v47 = vpop.permute.xlu0 %312  ;;  %v218_v33 = vand.u32 127, %v217_v30 }
  0x93   : > { %v331_v52 = vadd.f32 %v318_v46, %v296_v42  ;;  %v332_v53 = vadd.f32 %v318_v46, %v297_v43  ;;  %v329_v54 = vadd.f32 %v313_v47, %v294_v44  ;;  %v330_v55 = vadd.f32 %v313_v47, %v295_v45  ;;  %391 = vmatprep.subr.bf16.mxu0 %v346_v48 }
  0x94   : > { %618 = vmatprep.subr.bf16.mxu1 %v346_v48  ;;  %392 = vmatpush1.bf16.msra.mxu0 %v345_v49  ;;  %v219_v36 = vadd.s32 128, %v218_v33  ;;  %v224_v38 = vand.u32 15, %v218_v33  ;;  %vm497_vm2 = vcmp.lt.s32.totalorder %v218_v33, 112  ;;  %vm472_vm3 = vcmp.lt.s32.totalorder %v218_v33, 127 }
  0x95   : > { %v341_v56 = vmax.f32 %v331_v52, 0.0  ;;  %v342_v57 = vmax.f32 %v332_v53, 0.0  ;;  %v339_v58 = vmax.f32 %v329_v54, 0.0  ;;  %v340_v59 = vmax.f32 %v330_v55, 0.0  ;;  %621 = vmatpush1.bf16.msra.mxu1 %v345_v49 }
  0x96   : > { %v288_v60 = vpop.permute.xlu0 %287  ;;  %v323_v1 = vpop.permute.xlu1 %322  ;;  %v231_v39 = vand.u32 15, %v219_v36  ;;  %vm748_vm4 = vcmp.ne.s32.totalorder %v224_v38, 15  ;;  %vm247_vm6 = vcmp.lt.s32.totalorder %v219_v36, 240  ;;  %vm522_vm7 = vcmp.lt.s32.totalorder %v218_v33, 111 }
  0x97   : > { %v298_v61 = vmul.f32 %v288_v60, %v263_v50  ;;  %v299_v62 = vmul.f32 %v288_v60, %v264_v51  ;;  %v348_v63 = vpack.c.bf16 %v342_v57, %v340_v59  ;;  %v347_v0 = vpack.c.bf16 %v341_v56, %v339_v58 }
  0x98   : > { %vm752_vm5 = vcmp.ne.s32.totalorder %v231_v39, 15 }
  0x99   : > { %v333_v3 = vadd.f32 %v323_v1, %v298_v61  ;;  %v334_v4 = vadd.f32 %v323_v1, %v299_v62  ;;  %393 = vmatprep.subr.bf16.mxu0 %v348_v63  ;;  %619 = vmatprep.subr.bf16.mxu1 %v348_v63  ;;  %vm776_vm8 = vmand %vm752_vm5, %vm247_vm6 }
  0x9a   : > { %394 = vmatpush1.bf16.msra.mxu0 %v347_v0  ;;  %622 = vmatpush1.bf16.msra.mxu1 %v347_v0 }
  0x9b   : > { %v344_v5 = vmax.f32 %v334_v4, 0.0  ;;  %v343_v6 = vmax.f32 %v333_v3, 0.0 }
  0x9d   : > { %v350_v7 = vpack.c.bf16 %v344_v5, %v344_v5  ;;  %v349_v8 = vpack.c.bf16 %v343_v6, %v343_v6 }
  0x9f   : > { %610 = vmatprep.subr.msk.bf16.mxu0 %vm384_vm0, %v350_v7  ;;  %620 = vmatprep.subr.msk.bf16.mxu1 %vm384_vm0, %v350_v7  ;;  %v386_v9 = vsel %vm384_vm0, %v349_v8, 0 }
  0xa0   : > { %396 = vmatpush1.bf16.msra.mxu0 %v386_v9  ;;  %623 = vmatpush1.bf16.msra.mxu1 %v386_v9 }
  0xa3   : > { %611 = vmatmul.mubr.msk.bf16.vlgmr.msra.gmra.mrb[0].mxu0 %vm371_vm1, %v639_v10  ;;  %613 = vmatmul.mubr.msk.bf16.vlgmr.msra.gmra.mrb[0].mxu1 %vm371_vm1, %v640_v11 }
  0xa4   : > { %433 = vmatprep.mubr.bf16.mxu0 %v651_v2  ;;  %453 = vmatprep.mubr.bf16.mxu1 %v651_v2 }
  0xab   : > { %612 = vmatmul.mubr.msk.bf16.gmra.mrb[4].mxu0 %vm371_vm1, %v641_v12  ;;  %614 = vmatmul.mubr.msk.bf16.gmra.mrb[4].mxu1 %vm371_vm1, %v642_v13 }
 0x176   : > { %v425_v14 = vpop.f32.mrb[0].mxu0  ;;  %v445_v15 = vpop.f32.mrb[0].mxu1 }
 0x177   : > { %489 = vrot.lane.b32.xlu0 %v445_v15, %s652_s25  ;;  %v427_v16 = vpop.f32.mrb[1].mxu0  ;;  %v447_v17 = vpop.f32.mrb[1].mxu1 }
 0x178   : > { %v746_v18 = vpop.f32.mrb[2].mxu0  ;;  %v449_v19 = vpop.f32.mrb[2].mxu1 }
 0x179   : > { %491 = vrot.lane.b32.xlu1 %v449_v19, %s652_s25  ;;  %v431_v2 = vpop.f32.mrb[3].mxu0  ;;  %v451_v20 = vpop.f32.mrb[3].mxu1 }
 0x17b   : > { %493 = vrot.lane.b32.xlu0 %v447_v17, %s652_s25 }
 0x17d   : > { %495 = vrot.lane.b32.xlu1 %v451_v20, %s652_s25 }
 0x17e   : > { %v435_v21 = vpop.f32.mrb[4].mxu0  ;;  %v455_v22 = vpop.f32.mrb[4].mxu1 }
 0x17f   : > { %464 = vrot.lane.b32.xlu0 %v435_v21, %s653_s26  ;;  %v437_v23 = vpop.f32.mrb[5].mxu0  ;;  %v457_v24 = vpop.f32.mrb[5].mxu1 }
 0x180   : > { %v439_v25 = vpop.f32.mrb[6].mxu0  ;;  %v459_v26 = vpop.f32.mrb[6].mxu1 }
 0x181   : > { %466 = vrot.lane.b32.xlu1 %v439_v25, %s653_s26  ;;  %v441_v27 = vpop.f32.mrb[7].mxu0  ;;  %v461_v28 = vpop.f32.mrb[7].mxu1 }
 0x183   : > { %514 = vrot.lane.b32.xlu0 %v455_v22, %s654_s27 }
 0x185   : > { %516 = vrot.lane.b32.xlu1 %v459_v26, %s654_s27 }
 0x187   : > { %468 = vrot.lane.b32.xlu0 %v437_v23, %s653_s26 }
 0x189   : > { %470 = vrot.lane.b32.xlu1 %v441_v27, %s653_s26 }
 0x18b   : > { %518 = vrot.lane.b32.xlu0 %v457_v24, %s654_s27 }
 0x18d   : > { %520 = vrot.lane.b32.xlu1 %v461_v28, %s654_s27 }
 0x1e9   : > { %v490_v29 = vpop.permute.xlu0 %489 }
 0x1eb   : > { %v492_v31 = vpop.permute.xlu1 %491 }
 0x1ed   : > { %v494_v32 = vpop.permute.xlu0 %493 }
 0x1ee   : > { %v500_v45 = vsel %vm497_vm2, %v494_v32, %v490_v29  ;;  %v498_v56 = vsel %vm497_vm2, %v490_v29, %v494_v32 }
 0x1ef   : > { %v496_v34 = vpop.permute.xlu1 %495  ;;  %v507_v57 = vsel %vm247_vm6, %v500_v45, 0.0 }
 0x1f0   : > { %v501_v48 = vsel %vm497_vm2, %v496_v34, %v492_v31  ;;  %v499_v3 = vsel %vm497_vm2, %v492_v31, %v496_v34 }
 0x1f1   : > { %v465_v35 = vpop.permute.xlu0 %464  ;;  %v509_v4 = vsel %vm247_vm6, %v501_v48, 0.0 }
 0x1f3   : > { %v467_v37 = vpop.permute.xlu1 %466 }
 0x1f5   : > { %v515_v40 = vpop.permute.xlu0 %514 }
 0x1f7   : > { %v517_v41 = vpop.permute.xlu1 %516 }
 0x1f9   : > { %v469_v44 = vpop.permute.xlu0 %468 }
 0x1fa   : > { %v473_v46 = vsel %vm472_vm3, %v465_v35, %v469_v44  ;;  %v475_v47 = vsel %vm472_vm3, %v469_v44, %v465_v35 }
 0x1fb   : > { %v481_v49 = vsel %vm748_vm4, %v473_v46, 0.0  ;;  %v482_v50 = vsel %vm752_vm5, %v475_v47, 0.0  ;;  %v471_v51 = vpop.permute.xlu1 %470 }
 0x1fc   : > { %v485_v52 = vadd.f32 %v481_v49, %v425_v14  ;;  %v486_v53 = vadd.f32 %v482_v50, %v427_v16  ;;  %v474_v54 = vsel %vm472_vm3, %v467_v37, %v471_v51  ;;  %v476_v55 = vsel %vm472_vm3, %v471_v51, %v467_v37 }
 0x1fd   : > { %v483_v58 = vsel %vm748_vm4, %v474_v54, 0.0  ;;  %v484_v59 = vsel %vm752_vm5, %v476_v55, 0.0  ;;  %v519_v61 = vpop.permute.xlu0 %518 }
 0x1fe   : > { %v487_v62 = vadd.f32 %v483_v58, %v746_v18  ;;  %v488_v63 = vadd.f32 %v484_v59, %v431_v2  ;;  %v510_v0 = vadd.f32 %v498_v56, %v485_v52  ;;  %v511_v1 = vadd.f32 %v507_v57, %v486_v53 }
 0x1ff   : > { %v523_v5 = vsel %vm522_vm7, %v515_v40, %v519_v61  ;;  %v525_v6 = vsel %vm522_vm7, %v519_v61, %v515_v40  ;;  %v521_v7 = vpop.permute.xlu1 %520 }
 0x200   : > { %v531_v8 = vsel %vm748_vm4, %v523_v5, 0.0  ;;  %v532_v9 = vsel %vm776_vm8, %v525_v6, 0.0  ;;  %v512_v10 = vadd.f32 %v499_v3, %v487_v62  ;;  %v513_v11 = vadd.f32 %v509_v4, %v488_v63 }
 0x201   : > { %v535_v12 = vadd.f32 %v531_v8, %v510_v0  ;;  %v536_v13 = vadd.f32 %v532_v9, %v511_v1  ;;  %v524_v14 = vsel %vm522_vm7, %v517_v41, %v521_v7  ;;  %v526_v15 = vsel %vm522_vm7, %v521_v7, %v517_v41 }
 0x202   : > { %v533_v16 = vsel %vm748_vm4, %v524_v14, 0.0  ;;  %v534_v17 = vsel %vm776_vm8, %v526_v15, 0.0 }
 0x203   : > { %539 = vst [vmem:[%s197_s30] sm:$0xff] %v535_v12  ;;  %540 = vst [vmem:[%s197_s30 + $0x8] sm:$0xff] %v536_v13  ;;  %v537_v18 = vadd.f32 %v533_v16, %v512_v10  ;;  %v538_v19 = vadd.f32 %v534_v17, %v513_v11 }
 0x205   : > { %541 = vst [vmem:[%s197_s30 + $0x10] sm:$0xff] %v537_v18  ;;  %542 = vst [vmem:[%s197_s30 + $0x18] sm:$0xff] %v538_v19 }
 0x206 PF: > { %s14_s15 = sadd.s32 1, %s649_s15  }
 0x207   : > { %p11_p4 = scmp.ge.s32.totalorder %s14_s15, 4  }
 0x209   :  { %13 = sbr.rel (!%p11_p4) target bundleno = 1 (0x1), region = 66 }

</bundles_post_ra>
